<compile_context>
chip_gen: v7x
topology: tpu7x:2x2x1
jax: 0.10.0
libtpu: 0.0.40
codegen_flags: <defaults>
</compile_context>

<pallas_src>
import jax
import jax.numpy as jnp
from jax.experimental import pallas as pl
from jax.experimental.pallas import tpu as pltpu


# ---------------------------------------------------------------------------
# Hardware / planning helpers
# ---------------------------------------------------------------------------

def _vmem_capacity_bytes():
    """Physical VMEM per TensorCore; conservative default if the query fails."""
    try:
        cap = getattr(pltpu.get_tpu_info(), "vmem_capacity_bytes", None)
        if cap:
            return int(cap)
    except Exception:
        pass
    return 64 << 20  # v7x per-core size: a safe lower bound on every generation


def _divisors(x):
    ds = set()
    i = 1
    while i * i <= x:
        if x % i == 0:
            ds.add(i)
            ds.add(x // i)
        i += 1
    return sorted(ds)


_BLOCKDIAG_W_BUDGET = 16 << 20  # max bytes for one packed (G*d_in, G*d_out) weight tile


def _choose_feature_group(n, d_in, d_out, w_itemsize):
    """Pick feature-group size G (divisor of n).  Returns (G, packed).

    Preference order:
      1. smallest G with both G*d_in and G*d_out 128-aligned (lane-dense blocks)
         whose block-diagonal weight tile fits the budget        -> packed path
      2. G = n (blocks equal to the full feature dim are always legal)
         if the packed tile fits                                  -> packed path
      3. G = n with a per-feature loop kernel (no G^2 weight blow-up) -> slow path
    """
    aligned = [g for g in _divisors(n)
               if (g * d_in) % 128 == 0 and (g * d_out) % 128 == 0
               and w_itemsize * (g * d_in) * (g * d_out) <= _BLOCKDIAG_W_BUDGET]
    if aligned:
        return aligned[0], True
    if w_itemsize * (n * d_in) * (n * d_out) <= _BLOCKDIAG_W_BUDGET:
        return n, True
    return n, False


def _choose_batch_tile(B, G, d_in, d_out, x_itemsize, b_itemsize, w_tile_bytes,
                       budget, want_two_tiles):
    """Largest legal batch tile whose single-buffered working set fits `budget`.

    Legal tiles: divisors of B that are either B itself or a multiple of 8
    (second-to-last block-dim constraint).  If `want_two_tiles`, prefer a tile
    <= B/2 so the grid has >= 2 steps (keeps both v7x TensorCores busy).
    """
    def working_set(tb):
        return (x_itemsize * tb * G * d_in        # x tile
                + w_tile_bytes                    # resident weight tile
                + b_itemsize * G * d_out          # bias tile
                + x_itemsize * tb * G * d_out)    # output tile

    cands = [t for t in _divisors(B) if t == B or t % 8 == 0]
    fitting = [t for t in cands if working_set(t) <= budget]
    if not fitting:
        return min(cands)  # budget unreachable even at the smallest legal tile
    if want_two_tiles:
        split = [t for t in fitting if t <= B // 2]
        if split:
            return max(split)
    return max(fitting)


# ---------------------------------------------------------------------------
# One-time parameter relayout (do at param-creation/load time, NOT per call)
# ---------------------------------------------------------------------------

def pack_params(weight, bias, G, packed):
    """Relayout params into the kernel layout.

    weight: [n, d_out, d_in] (PyTorch nn.Linear layout), bias: [n, d_out].
    This is a full HBM read+write of the weights - keep it out of the hot path.
    """
    n, d_out, d_in = weight.shape
    wt = jnp.transpose(weight, (0, 2, 1))                     # [n, d_in, d_out]
    if packed:
        ng = n // G
        wg = wt.reshape(ng, G, d_in, d_out)
        eye = jnp.eye(G, dtype=weight.dtype)
        # wbd[p, g*d_in+a, h*d_out+b] = W_{pG+g}^T[a,b] * delta(g,h)  (block diagonal)
        wbd = jnp.einsum("pgab,gh->pgahb", wg, eye)
        w_k = wbd.reshape(ng, G * d_in, G * d_out)
    else:
        w_k = wt                                              # [n, d_in, d_out]
    b_k = bias.reshape(1, n * d_out)
    return w_k, b_k


# ---------------------------------------------------------------------------
# Kernel bodies
# ---------------------------------------------------------------------------

def _packed_kernel(x_ref, w_ref, b_ref, o_ref):
    # x_ref: (TB, G*d_in)   w_ref: (1, G*d_in, G*d_out)   b_ref: (1, G*d_out)
    y = jnp.dot(x_ref[...], w_ref[0], preferred_element_type=jnp.float32)
    o_ref[...] = (y + b_ref[...].astype(jnp.float32)).astype(o_ref.dtype)


def _make_loop_kernel(G, d_in, d_out):
    # Fallback (block-diagonal tile would be huge): per-feature dots, each result
    # (plus its bias slice) stored straight into its output slice - no concatenate,
    # so only one f32 partial is live at a time.
    def kernel(x_ref, w_ref, b_ref, o_ref):
        for g in range(G):  # static unroll
            y = jax.lax.dot_general(
                x_ref[:, g * d_in:(g + 1) * d_in], w_ref[g],
                dimension_numbers=(((1,), (0,)), ((), ())),
                preferred_element_type=jnp.float32)
            bg = b_ref[:, g * d_out:(g + 1) * d_out].astype(jnp.float32)
            o_ref[:, g * d_out:(g + 1) * d_out] = (y + bg).astype(o_ref.dtype)
    return kernel


# ---------------------------------------------------------------------------
# Wrapper
# ---------------------------------------------------------------------------

def nlinear_memory_efficient(x, weight, bias):
    """y[:, i] = x[:, i] @ weight[i].T + bias[i]  for i in range(n).

    Args:
      x:      [B, n, d_in]
      weight: [n, d_out, d_in]   (PyTorch nn.Linear weight layout per feature)
      bias:   [n, d_out]
    Returns:
      y:      [B, n, d_out]
    """
    B, n, d_in = x.shape
    d_out = weight.shape[1]

    x_isz = jnp.dtype(x.dtype).itemsize
    w_isz = jnp.dtype(weight.dtype).itemsize
    b_isz = jnp.dtype(bias.dtype).itemsize

    vmem_cap = _vmem_capacity_bytes()
    budget = vmem_cap // 4  # single-buffer working-set budget (~half VMEM when 2x buffered)

    G, packed = _choose_feature_group(n, d_in, d_out, w_isz)
    ng = n // G
    w_tile_bytes = w_isz * ((G * d_in) * (G * d_out) if packed else G * d_in * d_out)
    TB = _choose_batch_tile(B, G, d_in, d_out, x_isz, b_isz, w_tile_bytes,
                            budget, want_two_tiles=(ng == 1))

    # One-time parameter relayout (production code should store params pre-packed).
    w_k, b_k = pack_params(weight, bias, G, packed)

    # Free contiguous-merge views of the activations (no HBM transpose).
    x2 = x.reshape(B, n * d_in)

    # Feature-group axis OUTER, batch axis INNER: weight & bias blocks are unchanged
    # across consecutive inner steps, so Pallas keeps them resident (no re-DMA).
    grid = (ng, B // TB)

    if packed:
        kernel = _packed_kernel
        w_spec = pl.BlockSpec((1, G * d_in, G * d_out), lambda j, i: (j, 0, 0))
    else:
        kernel = _make_loop_kernel(G, d_in, d_out)
        w_spec = pl.BlockSpec((G, d_in, d_out), lambda j, i: (j, 0, 0))

    # dtype-accurate double-buffered working set -> explicit VMEM limit with headroom,
    # clamped to the queried physical capacity (128 MiB v5e/v6e, 64 MiB v7x).
    vmem_needed = 2 * (x_isz * TB * G * d_in + w_tile_bytes
                       + b_isz * G * d_out + x_isz * TB * G * d_out)
    vmem_limit = int(min(int(0.9 * vmem_cap),
                         max(vmem_needed + (4 << 20), 32 << 20)))

    # NOTE: on v7x, if the profile shows exposed DMA, add
    # pipeline_mode=pl.Buffered(3) to the x / output BlockSpecs (working set is small).
    y2 = pl.pallas_call(
        kernel,
        out_shape=jax.ShapeDtypeStruct((B, n * d_out), x.dtype),
        grid_spec=pltpu.PrefetchScalarGridSpec(
            num_scalar_prefetch=0,
            grid=grid,
            in_specs=[
                pl.BlockSpec((TB, G * d_in), lambda j, i: (i, j)),
                w_spec,
                pl.BlockSpec((1, G * d_out), lambda j, i: (0, j)),
            ],
            out_specs=pl.BlockSpec((TB, G * d_out), lambda j, i: (i, j)),
        ),
        compiler_params=pltpu.CompilerParams(
            dimension_semantics=("parallel", "parallel"),
            vmem_limit_bytes=vmem_limit,
        ),
    )(x2, w_k, b_k)

    return y2.reshape(B, n, d_out)


def init_params(key, n, d_in, d_out, dtype=jnp.float32):
    """Deterministic init mimicking torch.nn.Linear default (U(-1/sqrt(d_in), 1/sqrt(d_in)))."""
    kw, kb = jax.random.split(key)
    bound = 1.0 / jnp.sqrt(jnp.asarray(d_in, dtype=jnp.float32))
    weight = jax.random.uniform(kw, (n, d_out, d_in), dtype, -bound, bound)
    bias = jax.random.uniform(kb, (n, d_out), dtype, -bound, bound)
    return weight, bias


if __name__ == "__main__":
    B, n, d_in, d_out = 8, 4, 16, 32

    key = jax.random.PRNGKey(0)
    kx, kp = jax.random.split(key)
    x = jax.random.normal(kx, (B, n, d_in), jnp.float32)
    weight, bias = init_params(kp, n, d_in, d_out)

    y = nlinear_memory_efficient(x, weight, bias)
    y = jax.block_until_ready(y)

    # reference check (pure JAX): y_ref[:, i] = x[:, i] @ W_i^T + b_i
    y_ref = jnp.einsum("bni,noi->bno", x, weight) + bias[None, :, :]
    assert y.shape == (B, n, d_out)
    assert jnp.allclose(y, y_ref, atol=1e-5, rtol=1e-5)

    print("KERNEL_OK")
</pallas_src>

<mosaic_0001>
module attributes {stable_mosaic.version = 11 : i64} {
  func.func @_packed_kernel(%arg0: i32, %arg1: i32, %arg2: memref<8x64xf32, #tpu.memory_space<vmem>>, %arg3: memref<1x64x128xf32, #tpu.memory_space<vmem>>, %arg4: memref<1x128xf32, #tpu.memory_space<vmem>>, %arg5: memref<8x128xf32, #tpu.memory_space<vmem>>) attributes {dimension_semantics = [#tpu.dimension_semantics<parallel>, #tpu.dimension_semantics<parallel>], iteration_bounds = array<i64: 1, 1>, scalar_prefetch = 0 : i64, scratch_operands = 0 : i64, tpu.core_type = #tpu.core_type<tc>, window_params = [{transform_indices = @transform_0, window_bounds = array<i64: 8, 64>}, {transform_indices = @transform_1, window_bounds = array<i64: 1, 64, 128>}, {transform_indices = @transform_2, window_bounds = array<i64: 1, 128>}, {transform_indices = @transform_3, window_bounds = array<i64: 8, 128>}]} {
    %c0 = arith.constant 0 : index
    %c0_0 = arith.constant 0 : index
    %0 = vector.load %arg2[%c0, %c0_0] : memref<8x64xf32, #tpu.memory_space<vmem>>, vector<8x64xf32>
    %c0_1 = arith.constant 0 : index
    %c0_2 = arith.constant 0 : index
    %c0_3 = arith.constant 0 : index
    %1 = vector.load %arg3[%c0_1, %c0_2, %c0_3] : memref<1x64x128xf32, #tpu.memory_space<vmem>>, vector<1x64x128xf32>
    %2 = vector.shape_cast %1 : vector<1x64x128xf32> to vector<64x128xf32>
    %cst = arith.constant dense<0.000000e+00> : vector<8x128xf32>
    %3 = tpu.matmul %0, %2, %cst {dimension_numbers = #tpu.dot_dimension_numbers<[1], [0], [0], [1], [0, 0, 1, 1], [], []>} : vector<8x64xf32>, vector<64x128xf32>, vector<8x128xf32> -> vector<8x128xf32>
    %c0_4 = arith.constant 0 : index
    %c0_5 = arith.constant 0 : index
    %4 = vector.load %arg4[%c0_4, %c0_5] : memref<1x128xf32, #tpu.memory_space<vmem>>, vector<1x128xf32>
    %5 = vector.broadcast %4 : vector<1x128xf32> to vector<8x128xf32>
    %6 = arith.addf %3, %5 : vector<8x128xf32>
    %c0_6 = arith.constant 0 : index
    %c0_7 = arith.constant 0 : index
    %7 = vector.load %arg5[%c0_6, %c0_7] : memref<8x128xf32, #tpu.memory_space<vmem>>, vector<8x128xf32>
    tpu.vector_store %arg5[%c0_6, %c0_7], %6 {strides = array<i32>} : memref<8x128xf32, #tpu.memory_space<vmem>>, vector<8x128xf32>,
    return
  }
  func.func @transform_0(%arg0: i32, %arg1: i32) -> (i32, i32) {
    %c0_i32 = arith.constant 0 : i32
    return %arg1, %arg0 : i32, i32
  }
  func.func @transform_1(%arg0: i32, %arg1: i32) -> (i32, i32, i32) {
    %c0_i32 = arith.constant 0 : i32
    %c0_i32_0 = arith.constant 0 : i32
    %c0_i32_1 = arith.constant 0 : i32
    return %arg0, %c0_i32, %c0_i32_0 : i32, i32, i32
  }
  func.func @transform_2(%arg0: i32, %arg1: i32) -> (i32, i32) {
    %c0_i32 = arith.constant 0 : i32
    %c0_i32_0 = arith.constant 0 : i32
    return %c0_i32, %arg0 : i32, i32
  }
  func.func @transform_3(%arg0: i32, %arg1: i32) -> (i32, i32) {
    %c0_i32 = arith.constant 0 : i32
    return %arg1, %arg0 : i32, i32
  }
}

</mosaic_0001>

<bundles_post_ra>
// kernel: tpu_custom_call.1
= control target key start
LH: loop header
LB: loop body
LE: loop exit
PB: predicated region body
PF: predicated region fallthrough
CT: control target
= control target key end

     0   :  { %8 = vsyncpa [#allocation3], 0  ;;  %s344_s0 = inlined_call_operand.hbm [shape: f32[8,64], index: 0, kind: input, shape index: {}]   ;;  %s345_s1 = inlined_call_operand.hbm [shape: f32[1,64,128], index: 1, kind: input, shape index: {}]   ;;  %s346_s2 = inlined_call_operand.vmem [shape: f32[1,128], index: 2, kind: input, shape index: {}]   ;;  %s347_s3 = inlined_call_operand.hbm [shape: f32[8,128], index: 3, kind: output, shape index: {}]  }
   0x1   :  { %9 = vsyncpa [#allocation6], 0 }
   0x2   :  { %10 = vsyncpa [#allocation4], 0  ;;  %s270_s12 = smov [#allocation2]   ;;  %s271_s14 = smov [#allocation5]  }
   0x3   :  { %s17_s13 = sshll.u32 %s270_s12, 4  ;;  %s26_s15 = sshll.u32 %s271_s14, 4  ;;  %s18_s13 = int_to_ptr.vmem [resolvable:$true] %s17_s13  ;;  %s298_s15 = int_to_ptr.vmem [resolvable:$true] %s26_s15 }
   0x4   :  { %s198_s18 = scalar_lea.hbm %s344_s0, 128 }
   0x5   :  { %p199_p0 = scmp.ne.s32.totalorder %s344_s0, %s198_s18  ;;  %p202_p1 = scmp.lt.u32.totalorder %s198_s18, %s344_s0 }
   0x7   :  { %p204_p2 = pnand %p202_p1, %p199_p0 }
   0x9   :  { %207 = shalt.err (!%p204_p2)
}
   0xa   :  { %s208_s23 = scalar_lea.vmem %s18_s13, 128  ;;  %p213_p4 = scmp.lt.s32.totalorder %s18_s13, %s18_s13 }
   0xb   :  { %p209_p3 = scmp.ne.s32.totalorder %s18_s13, %s208_s23  ;;  %p214_p5 = scmp.lt.s32.totalorder %s208_s23, %s208_s23 }
   0xd   :  { %p215_p6 = por %p214_p5, %p213_p4 }
   0xf   :  { %p216_p7 = pnand %p215_p6, %p209_p3 }
  0x11   :  { %219 = shalt.err (!%p216_p7)
}
  0x12   :  { %20 = dma.hbm_to_vmem [thread:$0]  %s344_s0, 128, %s18_s13, [#allocation3]  }
  0x13   :  { %s220_s28 = scalar_lea.hbm %s345_s1, 1024 }
  0x14   :  { %p221_p8 = scmp.ne.s32.totalorder %s345_s1, %s220_s28  ;;  %p224_p9 = scmp.lt.u32.totalorder %s220_s28, %s345_s1 }
  0x16   :  { %p226_p10 = pnand %p224_p9, %p221_p8 }
  0x18   :  { %229 = shalt.err (!%p226_p10)
}
  0x19   :  { %s230_s6 = scalar_lea.vmem %s298_s15, 1024  ;;  %p235_p12 = scmp.lt.s32.totalorder %s298_s15, %s298_s15 }
  0x1a   :  { %p231_p11 = scmp.ne.s32.totalorder %s298_s15, %s230_s6  ;;  %p236_p13 = scmp.lt.s32.totalorder %s230_s6, %s230_s6 }
  0x1c   :  { %p237_p0 = por %p236_p13, %p235_p12 }
  0x1e   :  { %p238_p1 = pnand %p237_p0, %p231_p11 }
  0x20   :  { %241 = shalt.err (!%p238_p1)
}
  0x21   :  { %s272_s0 = smov 128   ;;  %s273_s7 = smov 8  }
  0x22   :  { %32 = dma.hbm_to_vmem [thread:$0]  %s345_s1, 1024, %s298_s15, [#allocation6], %s272_s0, %s272_s0, %s273_s7  }
  0x23   :  { %264 = dma.done.wait [#allocation3], 128  }
  0x24   :  { %265 = vsyncadd [#allocation3], 4294967168 }
  0x25   :  { %266 = dma.done.wait [#allocation6], 1024  }
  0x26   :  { %267 = vsyncadd [#allocation6], 4294966272  ;;  %v274_v0 = vmov 0.0|0.0   ;;  %vm275_vm0 = vmmov 0   ;;  %v276_v1 = vmov 0.0   ;;  %v42_v2 = vld [vmem:[#allocation5] sm:$0xff] }
  0x27   :  { %178 = vmatprep.subr.bf16.mxu0 %v274_v0  ;;  %175 = vmatprep.mubr.msk.f32.mxu0 %vm275_vm0, %v276_v1  ;;  %v43_v3 = vld [vmem:[#allocation5 + $0x8] sm:$0xff]  ;;  %v44_v4 = vld [vmem:[#allocation5 + $0x10] sm:$0xff]  ;;  %v45_v6 = vld [vmem:[#allocation5 + $0x18] sm:$0xff]  ;;  %vm57_vm1 = vcmask 523264   ;;  %s277_s11 = smov [#allocation7]  }
  0x28   :  { %v179_v5 = vpack.c.bf16 %v43_v3, %v42_v2  ;;  %v182_v7 = vpack.c.bf16 %v45_v6, %v44_v4  ;;  %v46_v8 = vld [vmem:[#allocation5 + $0x20] sm:$0xff]  ;;  %v47_v9 = vld [vmem:[#allocation5 + $0x28] sm:$0xff]  ;;  %v48_v11 = vld [vmem:[#allocation5 + $0x30] sm:$0xff]  ;;  %s138_s12 = sshll.u32 %s277_s11, 4  ;;  %s139_s12 = int_to_ptr.vmem [resolvable:$true] %s138_s12 }
  0x29   :  { %v185_v10 = vpack.c.bf16 %v47_v9, %v46_v8  ;;  %v49_v12 = vld [vmem:[#allocation5 + $0x38] sm:$0xff]  ;;  %s242_s13 = scalar_lea.vmem %s139_s12, 128  ;;  %p247_p3 = scmp.lt.s32.totalorder %s139_s12, %s139_s12 }
  0x2a   :  { %180 = vmatpush3.bf16.msra.mxu0 %v179_v5  ;;  %v188_v13 = vpack.c.bf16 %v49_v12, %v48_v11  ;;  %v41_v14 = vld [vmem:[#allocation2] sm:$0xff]  ;;  %p243_p2 = scmp.ne.s32.totalorder %s139_s12, %s242_s13  ;;  %p248_p4 = scmp.lt.s32.totalorder %s242_s13, %s242_s13 }
  0x2b   :  { %181 = vmatprep.subr.bf16.mxu0 %v274_v0  ;;  %v148_v15 = vld [vmem:[%s346_s2] ss:$0 sm:$0xff] }
  0x2c   :  { %p249_p5 = por %p248_p4, %p247_p3 }
  0x2e   :  { %183 = vmatpush3.bf16.msra.mxu0 %v182_v7  ;;  %p250_p6 = pnand %p249_p5, %p243_p2 }
  0x2f   :  { %184 = vmatprep.subr.bf16.mxu0 %v274_v0 }
  0x32   :  { %186 = vmatpush3.bf16.msra.mxu0 %v185_v10 }
  0x33   :  { %187 = vmatprep.subr.bf16.mxu0 %v274_v0 }
  0x36   :  { %189 = vmatpush3.bf16.msra.mxu0 %v188_v13 }
  0x39   :  { %176 = vmatmul.mubr.msk.f32.vlgmr.msra.gmra.mrb[0].mxu0 %vm57_vm1, %v41_v14 }
 0x10c   :  { %v127_v16 = vpop.f32.mrb[0].mxu0 }
 0x10d   :  { %v128_v17 = vadd.f32 %v148_v15, %v127_v16  ;;  %v177_v18 = vpop.f32.mrb[1].mxu0 }
 0x10f   :  { %131 = vst [vmem:[#allocation7] sm:$0xff] %v128_v17 }
 0x110   :  { %253 = shalt.err (!%p250_p6)
}
 0x111   :  { %s254_s16 = scalar_lea.hbm %s347_s3, 128 }
 0x112   :  { %p255_p7 = scmp.ne.s32.totalorder %s347_s3, %s254_s16  ;;  %p258_p8 = scmp.lt.u32.totalorder %s254_s16, %s347_s3 }
 0x114   :  { %p260_p9 = pnand %p258_p8, %p255_p7 }
 0x116   :  { %263 = shalt.err (!%p260_p9)
}
 0x117   :  { %141 = dma.vmem_to_hbm [thread:$0]  %s139_s12, 128, %s347_s3, [#allocation4]  }
 0x118   :  { %268 = dma.done.wait [#allocation4], 128  }
 0x119   :  { %269 = vsyncadd [#allocation4], 4294967168 }
 0x11a   :  { %145 = vsyncpa [#allocation3], 1 }
 0x11b   :  { %146 = vsyncpa [#allocation6], 1 }
 0x11c   :  { %147 = vsyncpa [#allocation4], 1 }

</bundles_post_ra>
